<compile_context>
chip_gen: v7x
topology: tpu7x:2x2x1
jax: 0.10.0
libtpu: 0.0.40
codegen_flags: <defaults>
</compile_context>

<pallas_src>
import jax
import jax.numpy as jnp
from jax.experimental import pallas as pl
from jax.experimental.pallas import tpu as pltpu


def _round_up(n, m):
    return ((n + m - 1) // m) * m


def linnet_kernel(x_ref, w1_ref, b1_ref, w2_ref, b2_ref, w3_ref, b3_ref,
                  w4_ref, b4_ref, out_ref):
    """Fused 4-layer MLP forward for one batch tile.

    x_ref : (TB, D_in)        bf16 VMEM
    wK_ref: (in_K, out_K)     bf16 VMEM (full weight; constant index -> resident)
    bK_ref: (1, out_K)        f32  VMEM (b4 padded class columns hold -1e30)
    out   : (TB, C_pad)       f32  VMEM (C_pad is a multiple of 128)
    """
    x = x_ref[...]  # bf16 straight into the MXU

    # fc1 + relu (f32 accumulate, f32 bias/ReLU epilogue)
    h = jnp.dot(x, w1_ref[...], preferred_element_type=jnp.float32) + b1_ref[...]
    h = jnp.maximum(h, 0.0).astype(jnp.bfloat16)

    # fc2 + relu
    h = jnp.dot(h, w2_ref[...], preferred_element_type=jnp.float32) + b2_ref[...]
    h = jnp.maximum(h, 0.0).astype(jnp.bfloat16)

    # fc3 + relu (dropout p=0.2 is identity in eval/inference mode)
    # TODO(synk): training-mode dropout (Bernoulli mask / (1-p) scaling) not implemented.
    h = jnp.dot(h, w3_ref[...], preferred_element_type=jnp.float32) + b3_ref[...]
    h = jnp.maximum(h, 0.0).astype(jnp.bfloat16)

    # fc4 + log_softmax over the (padded) class axis.  Padded bias columns are
    # -1e30 so exp(z) there is exactly 0 and the LSE over 128 lanes matches the
    # unpadded num_classes result for the real lanes.
    logits = jnp.dot(h, w4_ref[...], preferred_element_type=jnp.float32) + b4_ref[...]
    m = jnp.max(logits, axis=-1, keepdims=True)
    z = logits - m
    lse = jnp.log(jnp.sum(jnp.exp(z), axis=-1, keepdims=True))
    out_ref[...] = (z - lse).astype(out_ref.dtype)


def linnet_forward(x, params, *, batch_tile=512):
    """x: any shape (B, ...). Flattened to (B, input_size) like torch .view."""
    B = x.shape[0]
    x2 = x.reshape(B, -1)
    d_in = x2.shape[1]
    (w1, b1), (w2, b2), (w3, b3), (w4, b4) = params
    num_classes = w4.shape[1]

    # --- Lane-dense class padding: pad fc4 output width to a multiple of 128.
    c_pad = _round_up(max(num_classes, 128), 128)
    w4p = jnp.pad(w4, ((0, 0), (0, c_pad - num_classes)))
    b4p = jnp.pad(b4, ((0, 0), (0, c_pad - num_classes)), constant_values=-1e30)

    # --- bf16 MXU inputs (accumulation stays f32 in-kernel); biases stay f32.
    x2 = x2.astype(jnp.bfloat16)
    w1b, w2b, w3b, w4b = (w.astype(jnp.bfloat16) for w in (w1, w2, w3, w4p))
    b1f, b2f, b3f, b4f = (b.astype(jnp.float32) for b in (b1, b2, b3, b4p))

    # --- Batch tiling: big tiles for MXU row utilization; pad B to a multiple
    #     of the tile (cheap zero rows, sliced off below) instead of asserting.
    tb = min(_round_up(batch_tile, 8), _round_up(B, 8))
    b_pad = _round_up(B, tb)
    if b_pad != B:
        x2 = jnp.pad(x2, ((0, b_pad - B), (0, 0)))
    grid = (b_pad // tb,)

    def x_map(i):
        return (i, 0)

    def full_map(i):
        # Constant block index: Pallas keeps these weight/bias tiles resident
        # in VMEM across the whole grid (no per-step re-DMA).
        return (0, 0)

    out = pl.pallas_call(
        linnet_kernel,
        out_shape=jax.ShapeDtypeStruct((b_pad, c_pad), jnp.float32),
        grid_spec=pltpu.PrefetchScalarGridSpec(
            num_scalar_prefetch=0,
            grid=grid,
            in_specs=[
                pl.BlockSpec((tb, d_in), x_map),
                pl.BlockSpec(w1b.shape, full_map),
                pl.BlockSpec(b1f.shape, full_map),
                pl.BlockSpec(w2b.shape, full_map),
                pl.BlockSpec(b2f.shape, full_map),
                pl.BlockSpec(w3b.shape, full_map),
                pl.BlockSpec(b3f.shape, full_map),
                pl.BlockSpec(w4b.shape, full_map),
                pl.BlockSpec(b4f.shape, full_map),
            ],
            out_specs=pl.BlockSpec((tb, c_pad), x_map),
        ),
        compiler_params=pltpu.CompilerParams(
            dimension_semantics=("parallel",)),
    )(x2, w1b, b1f, w2b, b2f, w3b, b3f, w4b, b4f)

    # Drop batch padding and padded class lanes.
    return out[:B, :num_classes]


def init_params(key, input_size, num_classes):
    """Deterministic init matching the nn.Linear shapes of LinNet.

    PyTorch Linear has weight (out, in); we store the transpose (in, out) so
    the kernel hot path is x @ W + b.  Biases stored as (1, out).
    """
    dims = [input_size, 256, 128, 64, num_classes]
    params = []
    for i in range(4):
        key, kw, kb = jax.random.split(key, 3)
        fan_in, fan_out = dims[i], dims[i + 1]
        bound = 1.0 / jnp.sqrt(fan_in)
        w = jax.random.uniform(kw, (fan_in, fan_out), jnp.float32, -bound, bound)
        b = jax.random.uniform(kb, (1, fan_out), jnp.float32, -bound, bound)
        params.append((w, b))
    return params


def _reference_forward(x, params):
    """Pure-JAX reference using the same bf16-matmul / f32-epilogue math."""
    B = x.shape[0]
    h = x.reshape(B, -1)
    for idx, (w, b) in enumerate(params):
        h = jnp.dot(h.astype(jnp.bfloat16), w.astype(jnp.bfloat16),
                    preferred_element_type=jnp.float32) + b.astype(jnp.float32)
        if idx < 3:
            h = jnp.maximum(h, 0.0)
    return jax.nn.log_softmax(h, axis=-1)


if __name__ == "__main__":
    key = jax.random.PRNGKey(0)
    kx, kp = jax.random.split(key)

    # Small image-like input: batch=32, channels=4, spatial=8x8 -> input_size=256
    B, C, H, W = 32, 4, 8, 8
    input_size = C * H * W
    num_classes = 10

    x = jax.random.normal(kx, (B, C, H, W), dtype=jnp.float32)
    params = init_params(kp, input_size, num_classes)

    out = linnet_forward(x, params)
    out = jax.block_until_ready(out)
    assert out.shape == (B, num_classes)

    # Sanity 1: rows are valid log-probabilities (padded lanes carry 0 prob).
    row_prob_sum = jnp.sum(jnp.exp(out), axis=1)
    assert bool(jnp.all(jnp.abs(row_prob_sum - 1.0) < 1e-4))

    # Sanity 2: matches a pure-JAX reference with identical mixed-precision math.
    ref = _reference_forward(x, params)
    assert bool(jnp.max(jnp.abs(out - ref)) < 1e-2)

    print("KERNEL_OK")
</pallas_src>

<mosaic_0001>
module attributes {stable_mosaic.version = 11 : i64} {
  func.func @linnet_kernel(%arg0: i32, %arg1: memref<32x256xbf16, #tpu.memory_space<vmem>>, %arg2: memref<256x256xbf16, #tpu.memory_space<vmem>>, %arg3: memref<1x256xf32, #tpu.memory_space<vmem>>, %arg4: memref<256x128xbf16, #tpu.memory_space<vmem>>, %arg5: memref<1x128xf32, #tpu.memory_space<vmem>>, %arg6: memref<128x64xbf16, #tpu.memory_space<vmem>>, %arg7: memref<1x64xf32, #tpu.memory_space<vmem>>, %arg8: memref<64x128xbf16, #tpu.memory_space<vmem>>, %arg9: memref<1x128xf32, #tpu.memory_space<vmem>>, %arg10: memref<32x128xf32, #tpu.memory_space<vmem>>) attributes {dimension_semantics = [#tpu.dimension_semantics<parallel>], iteration_bounds = array<i64: 1>, scalar_prefetch = 0 : i64, scratch_operands = 0 : i64, tpu.core_type = #tpu.core_type<tc>, window_params = [{transform_indices = @transform_0, window_bounds = array<i64: 32, 256>}, {pipeline_mode = #tpu.pipeline_mode<synchronous>, transform_indices = @transform_1, window_bounds = array<i64: 256, 256>}, {pipeline_mode = #tpu.pipeline_mode<synchronous>, transform_indices = @transform_2, window_bounds = array<i64: 1, 256>}, {pipeline_mode = #tpu.pipeline_mode<synchronous>, transform_indices = @transform_3, window_bounds = array<i64: 256, 128>}, {pipeline_mode = #tpu.pipeline_mode<synchronous>, transform_indices = @transform_4, window_bounds = array<i64: 1, 128>}, {pipeline_mode = #tpu.pipeline_mode<synchronous>, transform_indices = @transform_5, window_bounds = array<i64: 128, 64>}, {pipeline_mode = #tpu.pipeline_mode<synchronous>, transform_indices = @transform_6, window_bounds = array<i64: 1, 64>}, {pipeline_mode = #tpu.pipeline_mode<synchronous>, transform_indices = @transform_7, window_bounds = array<i64: 64, 128>}, {pipeline_mode = #tpu.pipeline_mode<synchronous>, transform_indices = @transform_8, window_bounds = array<i64: 1, 128>}, {transform_indices = @transform_9, window_bounds = array<i64: 32, 128>}]} {
    %c0 = arith.constant 0 : index
    %c0_0 = arith.constant 0 : index
    %0 = vector.load %arg1[%c0, %c0_0] : memref<32x256xbf16, #tpu.memory_space<vmem>>, vector<32x256xbf16>
    %c0_1 = arith.constant 0 : index
    %c0_2 = arith.constant 0 : index
    %1 = vector.load %arg2[%c0_1, %c0_2] : memref<256x256xbf16, #tpu.memory_space<vmem>>, vector<256x256xbf16>
    %cst = arith.constant dense<0.000000e+00> : vector<32x256xf32>
    %2 = tpu.matmul %0, %1, %cst {dimension_numbers = #tpu.dot_dimension_numbers<[1], [0], [0], [1], [0, 0, 1, 1], [], []>} : vector<32x256xbf16>, vector<256x256xbf16>, vector<32x256xf32> -> vector<32x256xf32>
    %c0_3 = arith.constant 0 : index
    %c0_4 = arith.constant 0 : index
    %3 = vector.load %arg3[%c0_3, %c0_4] : memref<1x256xf32, #tpu.memory_space<vmem>>, vector<1x256xf32>
    %4 = vector.broadcast %3 : vector<1x256xf32> to vector<32x256xf32>
    %5 = arith.addf %2, %4 : vector<32x256xf32>
    %cst_5 = arith.constant 0.000000e+00 : f32
    %6 = vector.broadcast %cst_5 : f32 to vector<32x256xf32>
    %7 = arith.maximumf %5, %6 : vector<32x256xf32>
    %8 = arith.truncf %7 : vector<32x256xf32> to vector<32x256xbf16>
    %c0_6 = arith.constant 0 : index
    %c0_7 = arith.constant 0 : index
    %9 = vector.load %arg4[%c0_6, %c0_7] : memref<256x128xbf16, #tpu.memory_space<vmem>>, vector<256x128xbf16>
    %cst_8 = arith.constant dense<0.000000e+00> : vector<32x128xf32>
    %10 = tpu.matmul %8, %9, %cst_8 {dimension_numbers = #tpu.dot_dimension_numbers<[1], [0], [0], [1], [0, 0, 1, 1], [], []>} : vector<32x256xbf16>, vector<256x128xbf16>, vector<32x128xf32> -> vector<32x128xf32>
    %c0_9 = arith.constant 0 : index
    %c0_10 = arith.constant 0 : index
    %11 = vector.load %arg5[%c0_9, %c0_10] : memref<1x128xf32, #tpu.memory_space<vmem>>, vector<1x128xf32>
    %12 = vector.broadcast %11 : vector<1x128xf32> to vector<32x128xf32>
    %13 = arith.addf %10, %12 : vector<32x128xf32>
    %cst_11 = arith.constant 0.000000e+00 : f32
    %14 = vector.broadcast %cst_11 : f32 to vector<32x128xf32>
    %15 = arith.maximumf %13, %14 : vector<32x128xf32>
    %16 = arith.truncf %15 : vector<32x128xf32> to vector<32x128xbf16>
    %c0_12 = arith.constant 0 : index
    %c0_13 = arith.constant 0 : index
    %17 = vector.load %arg6[%c0_12, %c0_13] : memref<128x64xbf16, #tpu.memory_space<vmem>>, vector<128x64xbf16>
    %cst_14 = arith.constant dense<0.000000e+00> : vector<32x64xf32>
    %18 = tpu.matmul %16, %17, %cst_14 {dimension_numbers = #tpu.dot_dimension_numbers<[1], [0], [0], [1], [0, 0, 1, 1], [], []>} : vector<32x128xbf16>, vector<128x64xbf16>, vector<32x64xf32> -> vector<32x64xf32>
    %c0_15 = arith.constant 0 : index
    %c0_16 = arith.constant 0 : index
    %19 = vector.load %arg7[%c0_15, %c0_16] : memref<1x64xf32, #tpu.memory_space<vmem>>, vector<1x64xf32>
    %20 = vector.broadcast %19 : vector<1x64xf32> to vector<32x64xf32>
    %21 = arith.addf %18, %20 : vector<32x64xf32>
    %cst_17 = arith.constant 0.000000e+00 : f32
    %22 = vector.broadcast %cst_17 : f32 to vector<32x64xf32>
    %23 = arith.maximumf %21, %22 : vector<32x64xf32>
    %24 = arith.truncf %23 : vector<32x64xf32> to vector<32x64xbf16>
    %c0_18 = arith.constant 0 : index
    %c0_19 = arith.constant 0 : index
    %25 = vector.load %arg8[%c0_18, %c0_19] : memref<64x128xbf16, #tpu.memory_space<vmem>>, vector<64x128xbf16>
    %cst_20 = arith.constant dense<0.000000e+00> : vector<32x128xf32>
    %26 = tpu.matmul %24, %25, %cst_20 {dimension_numbers = #tpu.dot_dimension_numbers<[1], [0], [0], [1], [0, 0, 1, 1], [], []>} : vector<32x64xbf16>, vector<64x128xbf16>, vector<32x128xf32> -> vector<32x128xf32>
    %c0_21 = arith.constant 0 : index
    %c0_22 = arith.constant 0 : index
    %27 = vector.load %arg9[%c0_21, %c0_22] : memref<1x128xf32, #tpu.memory_space<vmem>>, vector<1x128xf32>
    %28 = vector.broadcast %27 : vector<1x128xf32> to vector<32x128xf32>
    %29 = arith.addf %26, %28 : vector<32x128xf32>
    %cst_23 = arith.constant dense<0xFF800000> : vector<32xf32>
    %30 = vector.multi_reduction <maximumf>, %29, %cst_23 [1] : vector<32x128xf32> to vector<32xf32>
    %31 = vector.shape_cast %30 : vector<32xf32> to vector<32x1xf32>
    %32 = vector.broadcast %31 : vector<32x1xf32> to vector<32x128xf32>
    %33 = arith.subf %29, %32 : vector<32x128xf32>
    %34 = math.exp %33 : vector<32x128xf32>
    %cst_24 = arith.constant dense<0.000000e+00> : vector<32xf32>
    %35 = vector.multi_reduction <add>, %34, %cst_24 [1] : vector<32x128xf32> to vector<32xf32>
    %36 = vector.shape_cast %35 : vector<32xf32> to vector<32x1xf32>
    %37 = math.log %36 : vector<32x1xf32>
    %38 = vector.broadcast %37 : vector<32x1xf32> to vector<32x128xf32>
    %39 = arith.subf %33, %38 : vector<32x128xf32>
    %c0_25 = arith.constant 0 : index
    %c0_26 = arith.constant 0 : index
    %40 = vector.load %arg10[%c0_25, %c0_26] : memref<32x128xf32, #tpu.memory_space<vmem>>, vector<32x128xf32>
    tpu.vector_store %arg10[%c0_25, %c0_26], %39 {strides = array<i32>} : memref<32x128xf32, #tpu.memory_space<vmem>>, vector<32x128xf32>,
    return
  }
  func.func @transform_0(%arg0: i32) -> (i32, i32) {
    %c0_i32 = arith.constant 0 : i32
    %c0_i32_0 = arith.constant 0 : i32
    return %arg0, %c0_i32 : i32, i32
  }
  func.func @transform_1(%arg0: i32) -> (i32, i32) {
    %c0_i32 = arith.constant 0 : i32
    %c0_i32_0 = arith.constant 0 : i32
    %c0_i32_1 = arith.constant 0 : i32
    return %c0_i32, %c0_i32_0 : i32, i32
  }
  func.func @transform_2(%arg0: i32) -> (i32, i32) {
    %c0_i32 = arith.constant 0 : i32
    %c0_i32_0 = arith.constant 0 : i32
    %c0_i32_1 = arith.constant 0 : i32
    return %c0_i32, %c0_i32_0 : i32, i32
  }
  func.func @transform_3(%arg0: i32) -> (i32, i32) {
    %c0_i32 = arith.constant 0 : i32
    %c0_i32_0 = arith.constant 0 : i32
    %c0_i32_1 = arith.constant 0 : i32
    return %c0_i32, %c0_i32_0 : i32, i32
  }
  func.func @transform_4(%arg0: i32) -> (i32, i32) {
    %c0_i32 = arith.constant 0 : i32
    %c0_i32_0 = arith.constant 0 : i32
    %c0_i32_1 = arith.constant 0 : i32
    return %c0_i32, %c0_i32_0 : i32, i32
  }
  func.func @transform_5(%arg0: i32) -> (i32, i32) {
    %c0_i32 = arith.constant 0 : i32
    %c0_i32_0 = arith.constant 0 : i32
    %c0_i32_1 = arith.constant 0 : i32
    return %c0_i32, %c0_i32_0 : i32, i32
  }
  func.func @transform_6(%arg0: i32) -> (i32, i32) {
    %c0_i32 = arith.constant 0 : i32
    %c0_i32_0 = arith.constant 0 : i32
    %c0_i32_1 = arith.constant 0 : i32
    return %c0_i32, %c0_i32_0 : i32, i32
  }
  func.func @transform_7(%arg0: i32) -> (i32, i32) {
    %c0_i32 = arith.constant 0 : i32
    %c0_i32_0 = arith.constant 0 : i32
    %c0_i32_1 = arith.constant 0 : i32
    return %c0_i32, %c0_i32_0 : i32, i32
  }
  func.func @transform_8(%arg0: i32) -> (i32, i32) {
    %c0_i32 = arith.constant 0 : i32
    %c0_i32_0 = arith.constant 0 : i32
    %c0_i32_1 = arith.constant 0 : i32
    return %c0_i32, %c0_i32_0 : i32, i32
  }
  func.func @transform_9(%arg0: i32) -> (i32, i32) {
    %c0_i32 = arith.constant 0 : i32
    %c0_i32_0 = arith.constant 0 : i32
    return %arg0, %c0_i32 : i32, i32
  }
}

</mosaic_0001>

<bundles_post_ra>
// kernel: tpu_custom_call.1
= control target key start
LH: loop header
LB: loop body
LE: loop exit
PB: predicated region body
PF: predicated region fallthrough
CT: control target
= control target key end

     0   :  { %14 = vsyncpa [#allocation3], 0  ;;  %s1309_s0 = inlined_call_operand.vmem [shape: bf16[32,256], index: 0, kind: input, shape index: {}]   ;;  %s1310_s1 = inlined_call_operand.hbm [shape: bf16[256,256], index: 1, kind: input, shape index: {}]   ;;  %s1311_s2 = inlined_call_operand.vmem [shape: f32[1,256], index: 2, kind: input, shape index: {}]   ;;  %s1312_s3 = inlined_call_operand.hbm [shape: bf16[256,128], index: 3, kind: input, shape index: {}]   ;;  %s1313_s4 = inlined_call_operand.vmem [shape: f32[1,128], index: 4, kind: input, shape index: {}]   ;;  %s1314_s5 = inlined_call_operand.vmem [shape: bf16[128,64], index: 5, kind: input, shape index: {}]   ;;  %s1315_s6 = inlined_call_operand.vmem [shape: f32[1,64], index: 6, kind: input, shape index: {}]   ;;  %s1316_s7 = inlined_call_operand.vmem [shape: bf16[64,128], index: 7, kind: input, shape index: {}]   ;;  %s1317_s8 = inlined_call_operand.vmem [shape: f32[1,128], index: 8, kind: input, shape index: {}]   ;;  %s1318_s9 = inlined_call_operand.hbm [shape: f32[32,128], index: 9, kind: output, shape index: {}]  }
   0x1   :  { %15 = vsyncpa [#allocation6], 0 }
   0x2   :  { %16 = vsyncpa [#allocation4], 0  ;;  %s1150_s30 = smov [#allocation2]   ;;  %s1078_s13 = scalar_lea.hbm %s1310_s1, 4096 }
   0x3   :  { %s24_s10 = sshll.u32 %s1150_s30, 4  ;;  %p1079_p0 = scmp.ne.s32.totalorder %s1310_s1, %s1078_s13  ;;  %s25_s10 = int_to_ptr.vmem [resolvable:$true] %s24_s10 }
   0x4   :  { %p1082_p1 = scmp.lt.u32.totalorder %s1078_s13, %s1310_s1 }
   0x6   :  { %p1084_p2 = pnand %p1082_p1, %p1079_p0 }
   0x8   :  { %1087 = shalt.err (!%p1084_p2)
}
   0x9   :  { %s1088_s18 = scalar_lea.vmem %s25_s10, 4096  ;;  %p1093_p4 = scmp.lt.s32.totalorder %s25_s10, %s25_s10 }
   0xa   :  { %p1089_p3 = scmp.ne.s32.totalorder %s25_s10, %s1088_s18  ;;  %p1094_p5 = scmp.lt.s32.totalorder %s1088_s18, %s1088_s18 }
   0xc   :  { %p1095_p6 = por %p1094_p5, %p1093_p4 }
   0xe   :  { %p1096_p7 = pnand %p1095_p6, %p1089_p3 }
  0x10   :  { %1099 = shalt.err (!%p1096_p7)
}
  0x11   :  { %s1151_s19 = smov 128   ;;  %s1152_s20 = smov 8  }
  0x12   :  { %30 = dma.hbm_to_vmem [thread:$0]  %s1310_s1, 4096, %s25_s10, [#allocation3], %s1151_s19, %s1151_s19, %s1152_s20  }
  0x13   :  { %s1153_s23 = smov [#allocation5]   ;;  %s1100_s27 = scalar_lea.hbm %s1312_s3, 2048 }
  0x14   :  { %s38_s24 = sshll.u32 %s1153_s23, 4  ;;  %p1101_p8 = scmp.ne.s32.totalorder %s1312_s3, %s1100_s27  ;;  %s39_s24 = int_to_ptr.vmem [resolvable:$true] %s38_s24 }
  0x15   :  { %p1104_p9 = scmp.lt.u32.totalorder %s1100_s27, %s1312_s3 }
  0x17   :  { %p1106_p10 = pnand %p1104_p9, %p1101_p8 }
  0x19   :  { %1109 = shalt.err (!%p1106_p10)
}
  0x1a   :  { %s1110_s12 = scalar_lea.vmem %s39_s24, 2048  ;;  %p1115_p12 = scmp.lt.s32.totalorder %s39_s24, %s39_s24 }
  0x1b   :  { %p1111_p11 = scmp.ne.s32.totalorder %s39_s24, %s1110_s12  ;;  %p1116_p13 = scmp.lt.s32.totalorder %s1110_s12, %s1110_s12 }
  0x1d   :  { %p1117_p0 = por %p1116_p13, %p1115_p12 }
  0x1f   :  { %p1118_p1 = pnand %p1117_p0, %p1111_p11 }
  0x21   :  { %1121 = shalt.err (!%p1118_p1)
}
  0x22   :  { %s1154_s1 = smov 64   ;;  %s1155_s10 = smov 4  }
  0x23   :  { %44 = dma.hbm_to_vmem [thread:$0]  %s1312_s3, 2048, %s39_s24, [#allocation6], %s1154_s1, %s1154_s1, %s1155_s10  }
  0x24   :  { %1144 = dma.done.wait [#allocation3], 4096  }
  0x25   :  { %1145 = vsyncadd [#allocation3], 4294963200 }
  0x26   :  { %1146 = dma.done.wait [#allocation6], 2048  }
  0x27   :  { %1147 = vsyncadd [#allocation6], 4294965248  ;;  %v980_v0 = vld [vmem:[#allocation2 + $0x4] ss:$8 sps:$4 sm:$0xff]   ;;  %v982_v1 = vld [vmem:[#allocation2] ss:$8 sps:$4 sm:$0xff]   ;;  %v100_v53 = vlaneseq }
  0x28   :  { %290 = vmatprep.subr.bf16.mxu0 %v980_v0  ;;  %v983_v2 = vld [vmem:[#allocation2 + $0x14] ss:$8 sps:$4 sm:$0xff]   ;;  %v985_v3 = vld [vmem:[#allocation2 + $0x10] ss:$8 sps:$4 sm:$0xff]   ;;  %v986_v4 = vld [vmem:[#allocation2 + $0x24] ss:$8 sps:$4 sm:$0xff]  }
  0x29   :  { %291 = vmatpush1.bf16.msra.mxu0 %v982_v1  ;;  %v988_v5 = vld [vmem:[#allocation2 + $0x20] ss:$8 sps:$4 sm:$0xff]   ;;  %v989_v6 = vld [vmem:[#allocation2 + $0x34] ss:$8 sps:$4 sm:$0xff]   ;;  %v991_v7 = vld [vmem:[#allocation2 + $0x30] ss:$8 sps:$4 sm:$0xff]  }
  0x2a   :  { %292 = vmatprep.subr.bf16.mxu0 %v983_v2  ;;  %v992_v8 = vld [vmem:[#allocation2 + $0x44] ss:$8 sps:$4 sm:$0xff]   ;;  %v994_v9 = vld [vmem:[#allocation2 + $0x40] ss:$8 sps:$4 sm:$0xff]   ;;  %v995_v10 = vld [vmem:[#allocation2 + $0x54] ss:$8 sps:$4 sm:$0xff]  }
  0x2b   :  { %v997_v11 = vld [vmem:[#allocation2 + $0x50] ss:$8 sps:$4 sm:$0xff]   ;;  %v998_v12 = vld [vmem:[#allocation2 + $0x64] ss:$8 sps:$4 sm:$0xff]   ;;  %v1000_v14 = vld [vmem:[#allocation2 + $0x60] ss:$8 sps:$4 sm:$0xff]  }
  0x2c   :  { %v1030_v13 = vld [vmem:[%s1309_s0 + $0x4] ss:$8 sps:$4 sm:$0xff]   ;;  %v1001_v15 = vld [vmem:[#allocation2 + $0x74] ss:$8 sps:$4 sm:$0xff]   ;;  %v1003_v17 = vld [vmem:[#allocation2 + $0x70] ss:$8 sps:$4 sm:$0xff]  }
  0x2d   :  { %293 = vmatpush1.bf16.msra.mxu0 %v985_v3  ;;  %322 = vmatprep.mubr.bf16.mxu0 %v1030_v13  ;;  %v1034_v16 = vld [vmem:[#allocation5 + $0x40] sm:$0xff]   ;;  %v1036_v20 = vld [vmem:[#allocation5 + $0x48] sm:$0xff]   ;;  %v1038_v22 = vld [vmem:[#allocation5 + $0x50] sm:$0xff]   ;;  %v101_v54 = vshrl.u32 %v100_v53, 7  ;;  %vm710_vm0 = vcmask 523264  }
  0x2e   :  { %294 = vmatprep.subr.bf16.mxu0 %v986_v4  ;;  %v1035_v18 = vld [vmem:[#allocation5] sm:$0xff]   ;;  %897 = vmatprep.subr.bf16.mxu1 %v1034_v16  ;;  %v1037_v21 = vld [vmem:[#allocation5 + $0x8] sm:$0xff]   ;;  %v1007_v24 = vld [vmem:[#allocation2 + $0x94] ss:$8 sps:$4 sm:$0xff]  }
  0x2f   :  { %v1004_v19 = vld [vmem:[#allocation2 + $0x84] ss:$8 sps:$4 sm:$0xff]   ;;  %898 = vmatpush3.bf16.msra.mxu1 %v1035_v18  ;;  %v1006_v23 = vld [vmem:[#allocation2 + $0x80] ss:$8 sps:$4 sm:$0xff]   ;;  %v1039_v25 = vld [vmem:[#allocation5 + $0x10] sm:$0xff]   ;;  %v102_v55 = vsub.s32 0, %v101_v54 }
  0x30   :  { %899 = vmatprep.subr.bf16.mxu1 %v1036_v20  ;;  %v1040_v26 = vld [vmem:[#allocation5 + $0x58] sm:$0xff]   ;;  %v1010_v28 = vld [vmem:[#allocation2 + $0xa4] ss:$8 sps:$4 sm:$0xff]   ;;  %v1012_v31 = vld [vmem:[#allocation2 + $0xa0] ss:$8 sps:$4 sm:$0xff]   ;;  %v106_v57 = vsub.s32 1, %v101_v54 }
  0x31   :  { %295 = vmatpush1.bf16.msra.mxu0 %v988_v5  ;;  %v1009_v27 = vld [vmem:[#allocation2 + $0x90] ss:$8 sps:$4 sm:$0xff]   ;;  %v1042_v30 = vld [vmem:[#allocation5 + $0x60] sm:$0xff]   ;;  %v1013_v33 = vld [vmem:[#allocation2 + $0xb4] ss:$8 sps:$4 sm:$0xff]  }
  0x32   :  { %296 = vmatprep.subr.bf16.mxu0 %v989_v6  ;;  %v1041_v29 = vld [vmem:[#allocation5 + $0x18] sm:$0xff]   ;;  %v1043_v32 = vld [vmem:[#allocation5 + $0x20] sm:$0xff]   ;;  %v1044_v34 = vld [vmem:[#allocation5 + $0x68] sm:$0xff]  }
  0x33   :  { %900 = vmatpush3.bf16.msra.mxu1 %v1037_v21  ;;  %v1015_v35 = vld [vmem:[#allocation2 + $0xb0] ss:$8 sps:$4 sm:$0xff]   ;;  %v1016_v36 = vld [vmem:[#allocation2 + $0xc4] ss:$8 sps:$4 sm:$0xff]   ;;  %v1018_v37 = vld [vmem:[#allocation2 + $0xc0] ss:$8 sps:$4 sm:$0xff]  }
  0x34   :  { %901 = vmatprep.subr.bf16.mxu1 %v1038_v22  ;;  %v1019_v38 = vld [vmem:[#allocation2 + $0xd4] ss:$8 sps:$4 sm:$0xff]   ;;  %v1021_v39 = vld [vmem:[#allocation2 + $0xd0] ss:$8 sps:$4 sm:$0xff]   ;;  %v1022_v40 = vld [vmem:[#allocation2 + $0xe4] ss:$8 sps:$4 sm:$0xff]  }
  0x35   :  { %297 = vmatpush1.bf16.msra.mxu0 %v991_v7  ;;  %v1024_v41 = vld [vmem:[#allocation2 + $0xe0] ss:$8 sps:$4 sm:$0xff]   ;;  %v1025_v42 = vld [vmem:[#allocation2 + $0xf4] ss:$8 sps:$4 sm:$0xff]   ;;  %v1027_v43 = vld [vmem:[#allocation2 + $0xf0] ss:$8 sps:$4 sm:$0xff]  }
  0x36   :  { %298 = vmatprep.subr.bf16.mxu0 %v992_v8  ;;  %v1028_v44 = vld [vmem:[%s1309_s0] ss:$8 sps:$4 sm:$0xff]   ;;  %v1031_v45 = vld [vmem:[%s1309_s0 + $0x14] ss:$8 sps:$4 sm:$0xff]   ;;  %v1033_v46 = vld [vmem:[%s1309_s0 + $0x10] ss:$8 sps:$4 sm:$0xff]  }
  0x37   :  { %902 = vmatpush3.bf16.msra.mxu1 %v1039_v25  ;;  %v1045_v47 = vld [vmem:[#allocation5 + $0x28] sm:$0xff]   ;;  %v1046_v48 = vld [vmem:[#allocation5 + $0x70] sm:$0xff]   ;;  %v1048_v50 = vld [vmem:[#allocation5 + $0x78] sm:$0xff]  }
  0x38   :  { %903 = vmatprep.subr.bf16.mxu1 %v1040_v26  ;;  %v1047_v49 = vld [vmem:[#allocation5 + $0x30] sm:$0xff]   ;;  %v1049_v51 = vld [vmem:[#allocation5 + $0x38] sm:$0xff]   ;;  %v1050_v52 = vld [vmem:[%s1314_s5] sm:$0xff]  }
  0x39   :  { %299 = vmatpush1.bf16.msra.mxu0 %v994_v9  ;;  %v98_v56 = vld [vmem:[%s1311_s2] sm:$0x3]  ;;  %v1051_v13 = vld [vmem:[%s1314_s5 + $0x8] sm:$0xff]   ;;  %v1052_v21 = vld [vmem:[%s1314_s5 + $0x10] sm:$0xff]  }
  0x3a   :  { %300 = vmatprep.subr.bf16.mxu0 %v995_v10  ;;  %v103_v58 = vrot.slane %v98_v56, %v102_v55  ;;  %v107_v59 = vrot.slane %v98_v56, %v106_v57  ;;  %v1053_v26 = vld [vmem:[%s1314_s5 + $0x18] sm:$0xff]   ;;  %v1060_v56 = vld [vmem:[%s1316_s7 + $0x10] sm:$0xff]  }
  0x3b   :  { %904 = vmatpush3.bf16.msra.mxu1 %v1041_v29  ;;  %v1056_v29 = vld [vmem:[%s1314_s5 + $0x30] sm:$0xff]   ;;  %v1061_v57 = vld [vmem:[%s1316_s7 + $0x18] sm:$0xff]  }
  0x3c   :  { %905 = vmatprep.subr.bf16.mxu1 %v1042_v30  ;;  %v1057_v30 = vld [vmem:[%s1314_s5 + $0x38] sm:$0xff]  }
  0x3d   :  { %301 = vmatpush1.bf16.msra.mxu0 %v997_v11 }
  0x3e   :  { %302 = vmatprep.subr.bf16.mxu0 %v998_v12 }
  0x3f   :  { %906 = vmatpush3.bf16.msra.mxu1 %v1043_v32  ;;  %v1059_v32 = vld [vmem:[%s1316_s7 + $0x8] sm:$0xff]  }
  0x40   :  { %907 = vmatprep.subr.bf16.mxu1 %v1044_v34  ;;  %v864_v34 = vld [vmem:[%s1313_s4] ss:$0 sm:$0xff] }
  0x41   :  { %303 = vmatpush1.bf16.msra.mxu0 %v1000_v14 }
  0x42   :  { %304 = vmatprep.subr.bf16.mxu0 %v1001_v15 }
  0x43   :  { %908 = vmatpush3.bf16.msra.mxu1 %v1045_v47 }
  0x44   :  { %909 = vmatprep.subr.bf16.mxu1 %v1046_v48 }
  0x45   :  { %305 = vmatpush1.bf16.msra.mxu0 %v1003_v17 }
  0x46   :  { %306 = vmatprep.subr.bf16.mxu0 %v1004_v19 }
  0x47   :  { %910 = vmatpush3.bf16.msra.mxu1 %v1047_v49 }
  0x48   :  { %911 = vmatprep.subr.bf16.mxu1 %v1048_v50 }
  0x49   :  { %307 = vmatpush1.bf16.msra.mxu0 %v1006_v23 }
  0x4a   :  { %308 = vmatprep.subr.bf16.mxu0 %v1007_v24 }
  0x4b   :  { %912 = vmatpush3.bf16.msra.mxu1 %v1049_v51 }
  0x4c   :  { %941 = vmatprep.subr.bf16.mxu1 %v1050_v52 }
  0x4d   :  { %309 = vmatpush1.bf16.msra.mxu0 %v1009_v27  ;;  %v1054_v27 = vld [vmem:[%s1314_s5 + $0x20] sm:$0xff]  }
  0x4e   :  { %310 = vmatprep.subr.bf16.mxu0 %v1010_v28  ;;  %v1055_v28 = vld [vmem:[%s1314_s5 + $0x28] sm:$0xff]  }
  0x51   :  { %311 = vmatpush1.bf16.msra.mxu0 %v1012_v31  ;;  %v1058_v31 = vld [vmem:[%s1316_s7] sm:$0xff]  }
  0x52   :  { %312 = vmatprep.subr.bf16.mxu0 %v1013_v33 }
  0x55   :  { %313 = vmatpush1.bf16.msra.mxu0 %v1015_v35 }
  0x56   :  { %314 = vmatprep.subr.bf16.mxu0 %v1016_v36 }
  0x59   :  { %315 = vmatpush1.bf16.msra.mxu0 %v1018_v37 }
  0x5a   :  { %316 = vmatprep.subr.bf16.mxu0 %v1019_v38 }
  0x5d   :  { %317 = vmatpush1.bf16.msra.mxu0 %v1021_v39 }
  0x5e   :  { %318 = vmatprep.subr.bf16.mxu0 %v1022_v40 }
  0x61   :  { %319 = vmatpush1.bf16.msra.mxu0 %v1024_v41 }
  0x62   :  { %320 = vmatprep.subr.bf16.mxu0 %v1025_v42 }
  0x65   :  { %321 = vmatpush1.bf16.msra.mxu0 %v1027_v43 }
  0x66   :  { %961 = vmatprep.subr.bf16.mxu0 %v1058_v31 }
  0x68   :  { %323 = vmatmul.mubr.bf16.vlgmr.msra.gmra.mrb[0].mxu0 %v1028_v44 }
  0x69   :  { %332 = vmatprep.mubr.bf16.mxu0 %v1031_v45  ;;  %962 = vmatpush3.bf16.msra.mxu0 %v1058_v31 }
  0x6a   :  { %963 = vmatprep.subr.bf16.mxu0 %v1059_v32 }
  0x6d   :  { %964 = vmatpush3.bf16.msra.mxu0 %v1059_v32 }
  0x6e   :  { %965 = vmatprep.subr.bf16.mxu0 %v1060_v56 }
  0x70   :  { %333 = vmatmul.mubr.bf16.gmra.mrb[4].mxu0 %v1033_v46 }
  0x71   :  { %966 = vmatpush3.bf16.msra.mxu0 %v1060_v56 }
  0x72   :  { %967 = vmatprep.subr.bf16.mxu0 %v1061_v57 }
  0x75   :  { %968 = vmatpush3.bf16.msra.mxu0 %v1061_v57 }
 0x13b   :  { %v324_v60 = vpop.f32.mrb[0].mxu0 }
 0x13c   :  { %v325_v61 = vadd.f32 %v324_v60, %v103_v58  ;;  %v326_v62 = vpop.f32.mrb[1].mxu0 }
 0x13d   :  { %v327_v63 = vadd.f32 %v326_v62, %v107_v59  ;;  %v328_v0 = vpop.f32.mrb[2].mxu0 }
 0x13e   :  { %v329_v1 = vadd.f32 %v328_v0, %v103_v58  ;;  %v330_v2 = vpop.f32.mrb[3].mxu0  ;;  %v343_v4 = vmax.f32 %v325_v61, 0.0 }
 0x13f   :  { %v331_v3 = vadd.f32 %v330_v2, %v107_v59  ;;  %v344_v6 = vmax.f32 %v327_v63, 0.0 }
 0x140   :  { %v345_v5 = vmax.f32 %v329_v1, 0.0 }
 0x141   :  { %v346_v7 = vmax.f32 %v331_v3, 0.0 }
 0x142   :  { %v351_v8 = vpack.c.bf16 %v345_v5, %v343_v4 }
 0x143   :  { %v334_v9 = vpop.f32.mrb[4].mxu0  ;;  %v352_v10 = vpack.c.bf16 %v346_v7, %v344_v6 }
 0x144   :  { %v335_v11 = vadd.f32 %v334_v9, %v103_v58  ;;  %v336_v12 = vpop.f32.mrb[5].mxu0  ;;  %v890_v9 = vld [vmem:[%s1317_s8] ss:$0 sm:$0xff] }
 0x145   :  { %v337_v14 = vadd.f32 %v336_v12, %v107_v59  ;;  %v338_v15 = vpop.f32.mrb[6].mxu0  ;;  %522 = vmatprep.mubr.bf16.mxu1 %v352_v10 }
 0x146   :  { %v339_v16 = vadd.f32 %v338_v15, %v103_v58  ;;  %v340_v17 = vpop.f32.mrb[7].mxu0  ;;  %523 = vmatmul.mubr.bf16.vlgmr.msra.gmra.mrb[0].mxu1 %v351_v8  ;;  %v347_v19 = vmax.f32 %v335_v11, 0.0  ;;  %v881_v58 = vld [vmem:[%s1315_s6] ss:$0 sm:$0xff]  ;;  %s1156_s6 = smov [#allocation7]  }
 0x147   :  { %v341_v18 = vadd.f32 %v340_v17, %v107_v59  ;;  %942 = vmatpush3.bf16.msra.mxu1 %v1050_v52  ;;  %v348_v22 = vmax.f32 %v337_v14, 0.0  ;;  %s815_s8 = sshll.u32 %s1156_s6, 4  ;;  %s816_s8 = int_to_ptr.vmem [resolvable:$true] %s815_s8 }
 0x148   :  { %v349_v20 = vmax.f32 %v339_v16, 0.0  ;;  %943 = vmatprep.subr.bf16.mxu1 %v1051_v13  ;;  %s1122_s28 = scalar_lea.vmem %s816_s8, 512  ;;  %p1127_p3 = scmp.lt.s32.totalorder %s816_s8, %s816_s8 }
 0x149   :  { %v350_v23 = vmax.f32 %v341_v18, 0.0  ;;  %p1123_p2 = scmp.ne.s32.totalorder %s816_s8, %s1122_s28  ;;  %p1128_p4 = scmp.lt.s32.totalorder %s1122_s28, %s1122_s28 }
 0x14a   :  { %v353_v24 = vpack.c.bf16 %v349_v20, %v347_v19 }
 0x14b   :  { %v354_v25 = vpack.c.bf16 %v350_v23, %v348_v22  ;;  %944 = vmatpush3.bf16.msra.mxu1 %v1051_v13  ;;  %p1129_p5 = por %p1128_p4, %p1127_p3 }
 0x14c   :  { %945 = vmatprep.subr.bf16.mxu1 %v1052_v21 }
 0x14d   :  { %530 = vmatprep.mubr.bf16.mxu1 %v354_v25  ;;  %p1130_p6 = pnand %p1129_p5, %p1123_p2 }
 0x14e   :  { %531 = vmatmul.mubr.bf16.gmra.mrb[4].mxu1 %v353_v24 }
 0x14f   :  { %946 = vmatpush3.bf16.msra.mxu1 %v1052_v21 }
 0x150   :  { %947 = vmatprep.subr.bf16.mxu1 %v1053_v26 }
 0x153   :  { %948 = vmatpush3.bf16.msra.mxu1 %v1053_v26 }
 0x154   :  { %949 = vmatprep.subr.bf16.mxu1 %v1054_v27 }
 0x157   :  { %950 = vmatpush3.bf16.msra.mxu1 %v1054_v27 }
 0x158   :  { %951 = vmatprep.subr.bf16.mxu1 %v1055_v28 }
 0x15b   :  { %952 = vmatpush3.bf16.msra.mxu1 %v1055_v28 }
 0x15c   :  { %953 = vmatprep.subr.bf16.mxu1 %v1056_v29 }
 0x15f   :  { %954 = vmatpush3.bf16.msra.mxu1 %v1056_v29 }
 0x160   :  { %955 = vmatprep.subr.bf16.mxu1 %v1057_v30 }
 0x163   :  { %956 = vmatpush3.bf16.msra.mxu1 %v1057_v30 }
 0x219   :  { %v913_v33 = vpop.f32.mrb[0].mxu1 }
 0x21a   :  { %v914_v35 = vpop.f32.mrb[1].mxu1 }
 0x21b   :  { %v915_v36 = vadd.f32 %v914_v35, %v913_v33  ;;  %v916_v37 = vpop.f32.mrb[2].mxu1 }
 0x21c   :  { %v917_v38 = vpop.f32.mrb[3].mxu1 }
 0x21d   :  { %v525_v39 = vadd.f32 %v915_v36, %v864_v34  ;;  %v918_v40 = vadd.f32 %v917_v38, %v916_v37 }
 0x21f   :  { %v528_v41 = vadd.f32 %v918_v40, %v864_v34  ;;  %v539_v42 = vmax.f32 %v525_v39, 0.0 }
 0x221   :  { %v540_v43 = vmax.f32 %v528_v41, 0.0  ;;  %v919_v44 = vpop.f32.mrb[4].mxu1 }
 0x222   :  { %v920_v45 = vpop.f32.mrb[5].mxu1 }
 0x223   :  { %v921_v46 = vadd.f32 %v920_v45, %v919_v44  ;;  %v922_v47 = vpop.f32.mrb[6].mxu1  ;;  %v543_v48 = vpack.c.bf16 %v540_v43, %v539_v42 }
 0x224   :  { %v923_v49 = vpop.f32.mrb[7].mxu1 }
 0x225   :  { %v533_v50 = vadd.f32 %v921_v46, %v864_v34  ;;  %v924_v51 = vadd.f32 %v923_v49, %v922_v47  ;;  %957 = vmatprep.mubr.bf16.mxu1 %v543_v48 }
 0x227   :  { %v536_v52 = vadd.f32 %v924_v51, %v864_v34  ;;  %v541_v53 = vmax.f32 %v533_v50, 0.0 }
 0x229   :  { %v542_v54 = vmax.f32 %v536_v52, 0.0 }
 0x22b   :  { %v544_v55 = vpack.c.bf16 %v542_v54, %v541_v53 }
 0x22d   :  { %958 = vmatmul.mubr.bf16.vlgmr.msra.gmra.mrb[8].mxu1 %v544_v55 }
 0x300   :  { %v959_v59 = vpop.f32.mrb[8].mxu1 }
 0x301   :  { %v659_v60 = vadd.f32 %v959_v59, %v881_v58  ;;  %v650_v61 = vpop.f32.mrb[9].mxu1 }
 0x302   :  { %v651_v62 = vadd.f32 %v881_v58, %v650_v61  ;;  %v960_v63 = vpop.f32.mrb[10].mxu1 }
 0x303   :  { %v662_v0 = vadd.f32 %v960_v63, %v881_v58  ;;  %v653_v1 = vpop.f32.mrb[11].mxu1  ;;  %v667_v3 = vmax.f32 %v659_v60, 0.0 }
 0x304   :  { %v654_v2 = vadd.f32 %v881_v58, %v653_v1  ;;  %v665_v5 = vmax.f32 %v651_v62, 0.0 }
 0x305   :  { %v668_v4 = vmax.f32 %v662_v0, 0.0 }
 0x306   :  { %v666_v6 = vmax.f32 %v654_v2, 0.0 }
 0x307   :  { %v670_v7 = vpack.c.bf16 %v668_v4, %v667_v3 }
 0x308   :  { %v669_v8 = vpack.c.bf16 %v666_v6, %v665_v5 }
 0x30a   :  { %969 = vmatprep.mubr.msk.bf16.mxu0 %vm710_vm0, %v669_v8 }
 0x30b   :  { %970 = vmatmul.mubr.msk.bf16.vlgmr.msra.gmra.mrb[8].mxu0 %vm710_vm0, %v670_v7 }
 0x3de   :  { %v971_v10 = vpop.f32.mrb[8].mxu0 }
 0x3df   :  { %v760_v11 = vadd.f32 %v971_v10, %v890_v9  ;;  %v751_v12 = vpop.f32.mrb[9].mxu0 }
 0x3e0   :  { %v752_v13 = vadd.f32 %v890_v9, %v751_v12  ;;  %v972_v14 = vpop.f32.mrb[10].mxu0 }
 0x3e1   :  { %770 = vmax.xlane.f32.xlu1 %v760_v11  ;;  %v754_v15 = vpop.f32.mrb[11].mxu0  ;;  %v763_v16 = vadd.f32 %v972_v14, %v890_v9 }
 0x3e2   :  { %766 = vmax.xlane.f32.xlu0 %v752_v13  ;;  %v755_v17 = vadd.f32 %v890_v9, %v754_v15 }
 0x3e5   :  { %772 = vmax.xlane.f32.xlu1 %v763_v16 }
 0x3e6   :  { %768 = vmax.xlane.f32.xlu0 %v755_v17 }
 0x46e   :  { %v771_v18 = vpop.xlane.xlu1 %770 }
 0x46f   :  { %v776_v19 = vsub.f32 %v760_v11, %v771_v18  ;;  %v767_v20 = vpop.xlane.xlu0 %766 }
 0x470   :  { %v774_v21 = vsub.f32 %v752_v13, %v767_v20 }
 0x471   :  { %v782_v24 = vmul.f32 1.442695, %v776_v19 }
 0x472   :  { %v778_v22 = vmul.f32 1.442695, %v774_v21  ;;  %v773_v23 = vpop.xlane.xlu1 %772 }
 0x473   :  { %v769_v25 = vpop.xlane.xlu0 %768  ;;  %v777_v26 = vsub.f32 %v763_v16, %v773_v23 }
 0x474   :  { %1062 = vpow2.f32 %v778_v22  ;;  %v775_v27 = vsub.f32 %v755_v17, %v769_v25 }
 0x475   :  { %1064 = vpow2.f32 %v782_v24  ;;  %v784_v29 = vmul.f32 1.442695, %v777_v26 }
 0x476   :  { %v780_v28 = vmul.f32 1.442695, %v775_v27 }
 0x478   :  { %1066 = vpow2.f32 %v780_v28 }
 0x479   :  { %1068 = vpow2.f32 %v784_v29 }
 0x47e   :  { %v1063_v30 = vpop.eup %1062 }
 0x47f   :  { %786 = vadd.xlane.f32.xlu0 %v1063_v30  ;;  %v1065_v31 = vpop.eup %1064 }
 0x482   :  { %v1067_v32 = vpop.eup %1066 }
 0x483   :  { %790 = vadd.xlane.f32.xlu0 %v1065_v31  ;;  %788 = vadd.xlane.f32.xlu1 %v1067_v32  ;;  %v1069_v33 = vpop.eup %1068 }
 0x487   :  { %792 = vadd.xlane.f32.xlu1 %v1069_v33 }
 0x50c   :  { %v787_v34 = vpop.xlane.xlu0 %786 }
 0x50d   :  { %1070 = vlog2.f32 %v787_v34 }
 0x510   :  { %v789_v35 = vpop.xlane.xlu1 %788  ;;  %v791_v36 = vpop.xlane.xlu0 %790 }
 0x511   :  { %1072 = vlog2.f32 %v789_v35 }
 0x512   :  { %1074 = vlog2.f32 %v791_v36 }
 0x514   :  { %v793_v37 = vpop.xlane.xlu1 %792 }
 0x515   :  { %1076 = vlog2.f32 %v793_v37 }
 0x517   :  { %v1071_v38 = vpop.eup %1070 }
 0x518   :  { %v795_v39 = vmul.f32 0.6931472, %v1071_v38 }
 0x51a   :  { %v802_v40 = vsub.f32 %v774_v21, %v795_v39 }
 0x51b   :  { %v1073_v41 = vpop.eup %1072 }
 0x51c   :  { %v1075_v42 = vpop.eup %1074  ;;  %806 = vst [vmem:[#allocation7] sm:$0xff] %v802_v40  ;;  %v797_v43 = vmul.f32 0.6931472, %v1073_v41 }
 0x51d   :  { %v799_v44 = vmul.f32 0.6931472, %v1075_v42 }
 0x51e   :  { %v803_v45 = vsub.f32 %v775_v27, %v797_v43 }
 0x51f   :  { %v1077_v46 = vpop.eup %1076  ;;  %v804_v47 = vsub.f32 %v776_v19, %v799_v44 }
 0x520   :  { %807 = vst [vmem:[#allocation7 + $0x8] sm:$0xff] %v803_v45  ;;  %v801_v48 = vmul.f32 0.6931472, %v1077_v46 }
 0x521   :  { %808 = vst [vmem:[#allocation7 + $0x10] sm:$0xff] %v804_v47 }
 0x522   :  { %v805_v49 = vsub.f32 %v777_v26, %v801_v48 }
 0x524   :  { %809 = vst [vmem:[#allocation7 + $0x18] sm:$0xff] %v805_v49 }
 0x525   :  { %1133 = shalt.err (!%p1130_p6)
}
 0x526   :  { %s1134_s11 = scalar_lea.hbm %s1318_s9, 512 }
 0x527   :  { %p1135_p7 = scmp.ne.s32.totalorder %s1318_s9, %s1134_s11  ;;  %p1138_p8 = scmp.lt.u32.totalorder %s1134_s11, %s1318_s9 }
 0x529   :  { %p1140_p9 = pnand %p1138_p8, %p1135_p7 }
 0x52b   :  { %1143 = shalt.err (!%p1140_p9)
}
 0x52c   :  { %821 = dma.vmem_to_hbm [thread:$0]  %s816_s8, 512, %s1318_s9, [#allocation4], %s1151_s19, %s1151_s19, %s1152_s20  }
 0x52d   :  { %1148 = dma.done.wait [#allocation4], 512  }
 0x52e   :  { %1149 = vsyncadd [#allocation4], 4294966784 }
 0x52f   :  { %825 = vsyncpa [#allocation3], 1 }
 0x530   :  { %826 = vsyncpa [#allocation6], 1 }
 0x531   :  { %827 = vsyncpa [#allocation4], 1 }

</bundles_post_ra>
